<compile_context>
chip_gen: v7x
topology: tpu7x:2x2x1
jax: 0.10.0
libtpu: 0.0.40
codegen_flags: <defaults>
</compile_context>

<pallas_src>
import jax
import jax.numpy as jnp
from jax.experimental import pallas as pl
from jax.experimental.pallas import tpu as pltpu

LANES = 128              # lane width of a vreg
SUBLANES = 8             # sublane count of a vreg
SMALL_BATCH_ELEMS = 1 << 16   # below this, fused XLA beats kernel-launch overhead


def _round_up(x, m):
    return ((x + m - 1) // m) * m


def _default_tile_rows():
    # (tile_rows, 128) f32 blocks. Double-buffered in+out:
    #   4096 rows -> 2 MiB/block -> 8 MiB pipelined  (fits v5e's 16 MiB scoped VMEM)
    #   8192 rows -> 4 MiB/block -> 16 MiB pipelined (fits v7x's 32 MiB scoped VMEM)
    # v7x HBM (~3.2 TB/s) makes per-step overhead relatively larger -> bigger tiles.
    try:
        kind = jax.devices()[0].device_kind.lower()
    except Exception:
        kind = ""
    if ("v7" in kind) or ("7x" in kind):
        return 8192
    return 4096


def _affine_kernel(params_ref, x_ref, o_ref):
    # params_ref: SMEM (2,) = [w_eff, b_eff]; x_ref/o_ref: VMEM (tr, 128) tiles.
    # Pure VPU FMA: no MXU/XLU, lane-dense loads/stores, HBM-bandwidth bound.
    o_ref[...] = x_ref[...] * params_ref[0] + params_ref[1]


def model_forward(x, w1, b1, w2, b2, *, tile_rows=None,
                  min_pallas_elems=SMALL_BATCH_ELEMS):
    """y = linear2(linear1(x)) for x of shape [B, 1] (float32)."""
    B, F = x.shape
    assert F == 1, "Model.forward expects [B, 1] inputs (Linear(1, 10) first layer)."

    # --- trace-time algebraic fold (plain XLA, outside the kernel; exact) ---
    w_eff = jnp.dot(w2, w1)[0, 0]                  # [1,10] @ [10,1] -> scalar
    b_eff = jnp.dot(w2, b1)[0] + b2[0]             # scalar

    xf = x.reshape(-1).astype(jnp.float32)         # free reshape: [B,1] -> [B]
    n = xf.shape[0]

    # --- tiny-batch short-circuit (covers the [[4.0]] demo): one fused XLA FMA ---
    if n < min_pallas_elems:
        return (xf * w_eff + b_eff).reshape(B, F)

    params = jnp.stack([w_eff, b_eff]).astype(jnp.float32)   # (2,) -> SMEM

    # --- lane-dense layout: batch on the 128-lane axis ---
    # Pad only to the next multiple of 128 (needed for the free 1-D -> 2-D reshape),
    # never to a tile multiple: ragged last row-blocks are masked by Pallas.
    n128 = _round_up(n, LANES)
    padded = n128 != n
    if padded:
        # TODO(synk): this pad (and the matching [:n] slice below) each cost one
        # extra HBM pass; taken only when B is not a multiple of 128.
        xf = jnp.pad(xf, (0, n128 - n))
    rows = n128 // LANES
    x_slab = xf.reshape(rows, LANES)

    if tile_rows is None:
        tile_rows = _default_tile_rows()
    tile_rows = max(SUBLANES, _round_up(tile_rows, SUBLANES))   # (8,128) legality

    if rows <= 2 * SUBLANES:
        tr = rows                 # single full-array block (always legal per-dim)
    elif rows <= tile_rows:
        # Fits in one tile: split into ~2 blocks so the "parallel" axis can shard
        # across both v7x TensorCores (harmless one extra step elsewhere).
        tr = _round_up(pl.cdiv(rows, 2), SUBLANES)
    else:
        tr = tile_rows
    num_tiles = pl.cdiv(rows, tr)   # last block may be partial -> masked by Pallas

    out_slab = pl.pallas_call(
        _affine_kernel,
        out_shape=jax.ShapeDtypeStruct((rows, LANES), jnp.float32),
        grid=(num_tiles,),
        in_specs=[
            pl.BlockSpec(memory_space=pltpu.MemorySpace.SMEM),   # folded scalars
            pl.BlockSpec((tr, LANES), lambda i: (i, 0)),         # x tile
        ],
        out_specs=pl.BlockSpec((tr, LANES), lambda i: (i, 0)),
        compiler_params=pltpu.CompilerParams(
            dimension_semantics=("parallel",),   # shard batch tiles across TCs
        ),
    )(params, x_slab)

    out = out_slab.reshape(-1)
    if padded:
        out = out[:n]
    return out.reshape(B, F)


def init_params(key):
    """Deterministic init mimicking nn.Linear's U(-1/sqrt(fan_in), +1/sqrt(fan_in))."""
    k1, k2, k3, k4, kq, kk, kv = jax.random.split(key, 7)
    # linear1: Linear(1, 10)
    lim1 = 1.0
    w1 = jax.random.uniform(k1, (10, 1), jnp.float32, -lim1, lim1)
    b1 = jax.random.uniform(k2, (10,), jnp.float32, -lim1, lim1)
    # linear2: Linear(10, 1)
    lim2 = 1.0 / jnp.sqrt(10.0)
    w2 = jax.random.uniform(k3, (1, 10), jnp.float32, -lim2, lim2)
    b2 = jax.random.uniform(k4, (1,), jnp.float32, -lim2, lim2)
    # SelfAttention params (never used in Model.forward; kept for structural fidelity)
    # TODO(synk): SelfAttention is not invoked by Model.forward, so its 1x1-conv
    # attention path is intentionally not lowered to a kernel.
    attn = {
        "query_conv_w": jax.random.normal(kq, (64, 512, 1, 1), jnp.float32) * 0.02,
        "key_conv_w": jax.random.normal(kk, (64, 512, 1, 1), jnp.float32) * 0.02,
        "value_conv_w": jax.random.normal(kv, (512, 512, 1, 1), jnp.float32) * 0.02,
        "gamma": jnp.zeros((1,), jnp.float32),
    }
    return (w1, b1, w2, b2), attn


if __name__ == "__main__":
    key = jax.random.PRNGKey(0)
    (w1, b1, w2, b2), _attn = init_params(key)

    def reference(x):
        # Unfolded two-linear reference in plain JAX.
        return (x @ w1.T + b1) @ w2.T + b2

    # 1) The module's demo case (x = [[4.0]], plus one extra row): XLA fast path.
    x_small = jnp.array([[4.0], [2.0]], dtype=jnp.float32)
    y_small = model_forward(x_small, w1, b1, w2, b2)
    jax.block_until_ready(y_small)
    assert y_small.shape == (2, 1)
    assert jnp.allclose(y_small, reference(x_small), atol=1e-5, rtol=1e-5)

    # 2) Same tiny input forced through the Pallas kernel (single (1,128) block).
    y_small_k = model_forward(x_small, w1, b1, w2, b2, min_pallas_elems=0)
    jax.block_until_ready(y_small_k)
    assert jnp.allclose(y_small_k, reference(x_small), atol=1e-5, rtol=1e-5)

    # 3) Ragged larger batch: exercises multi-block grid + masked boundary block.
    kx = jax.random.fold_in(key, 1)
    x_big = jax.random.normal(kx, (130_000, 1), jnp.float32)
    y_big = model_forward(x_big, w1, b1, w2, b2)
    jax.block_until_ready(y_big)
    assert y_big.shape == (130_000, 1)
    assert jnp.allclose(y_big, reference(x_big), atol=1e-5, rtol=1e-5)

    print("KERNEL_OK")
</pallas_src>

<mosaic_0001>
module attributes {stable_mosaic.version = 11 : i64} {
  func.func @_affine_kernel(%arg0: i32, %arg1: memref<2xf32, #tpu.memory_space<smem>>, %arg2: memref<1x128xf32, #tpu.memory_space<vmem>>, %arg3: memref<1x128xf32, #tpu.memory_space<vmem>>) attributes {dimension_semantics = [#tpu.dimension_semantics<parallel>], iteration_bounds = array<i64: 1>, scalar_prefetch = 0 : i64, scratch_operands = 0 : i64, tpu.core_type = #tpu.core_type<tc>, window_params = [{transform_indices = @transform_0, window_bounds = array<i64: 2>}, {transform_indices = @transform_1, window_bounds = array<i64: 1, 128>}, {transform_indices = @transform_2, window_bounds = array<i64: 1, 128>}]} {
    %c0 = arith.constant 0 : index
    %c0_0 = arith.constant 0 : index
    %0 = vector.load %arg2[%c0, %c0_0] : memref<1x128xf32, #tpu.memory_space<vmem>>, vector<1x128xf32>
    %c0_1 = arith.constant 0 : index
    %1 = memref.load %arg1[%c0_1] : memref<2xf32, #tpu.memory_space<smem>>
    %2 = vector.broadcast %1 : f32 to vector<1x128xf32>
    %3 = arith.mulf %0, %2 : vector<1x128xf32>
    %c1 = arith.constant 1 : index
    %4 = memref.load %arg1[%c1] : memref<2xf32, #tpu.memory_space<smem>>
    %5 = vector.broadcast %4 : f32 to vector<1x128xf32>
    %6 = arith.addf %3, %5 : vector<1x128xf32>
    %c0_2 = arith.constant 0 : index
    %c0_3 = arith.constant 0 : index
    %7 = vector.load %arg3[%c0_2, %c0_3] : memref<1x128xf32, #tpu.memory_space<vmem>>, vector<1x128xf32>
    tpu.vector_store %arg3[%c0_2, %c0_3], %6 {strides = array<i32>} : memref<1x128xf32, #tpu.memory_space<vmem>>, vector<1x128xf32>,
    return
  }
  func.func @transform_0(%arg0: i32) -> i32 {
    %c0_i32 = arith.constant 0 : i32
    %c0_i32_0 = arith.constant 0 : i32
    return %c0_i32 : i32
  }
  func.func @transform_1(%arg0: i32) -> (i32, i32) {
    %c0_i32 = arith.constant 0 : i32
    %c0_i32_0 = arith.constant 0 : i32
    return %arg0, %c0_i32 : i32, i32
  }
  func.func @transform_2(%arg0: i32) -> (i32, i32) {
    %c0_i32 = arith.constant 0 : i32
    %c0_i32_0 = arith.constant 0 : i32
    return %arg0, %c0_i32 : i32, i32
  }
}

</mosaic_0001>

<bundles_post_ra>
// kernel: tpu_custom_call.1
= control target key start
LH: loop header
LB: loop body
LE: loop exit
PB: predicated region body
PF: predicated region fallthrough
CT: control target
= control target key end

     0   :  { %7 = vsyncpa [#allocation4], 0  ;;  %s129_s0 = inlined_call_operand.hbm [shape: f32[2], index: 0, kind: input, shape index: {}]   ;;  %s130_s1 = inlined_call_operand.vmem [shape: f32[1,128], index: 1, kind: input, shape index: {}]   ;;  %s131_s2 = inlined_call_operand.hbm [shape: f32[1,128], index: 2, kind: output, shape index: {}]  }
   0x1   :  { %8 = vsyncpa [#allocation3], 0  ;;  %s49_s11 = scalar_lea.hbm %s129_s0, 16 }
   0x2   :  { %p50_p0 = scmp.ne.s32.totalorder %s129_s0, %s49_s11  ;;  %p53_p1 = scmp.lt.u32.totalorder %s49_s11, %s129_s0 }
   0x4   :  { %p55_p2 = pnand %p53_p1, %p50_p0 }
   0x6   :  { %58 = shalt.err (!%p55_p2)
}
   0x7   :  { %s85_s16 = smov [#allocation2]  }
   0x8   :  { %16 = dma.hbm_to_smem %s129_s0, 16, %s85_s16, [#allocation4]  }
   0x9   :  { %81 = dma.done.wait [#allocation4], 16  }
   0xa   :  { %82 = vsyncadd [#allocation4], 4294967280 }
   0xb   :  { %22 = sfence }
   0xc   :  { %s24_s19 = sld [smem:[#allocation2]]  ;;  %s46_s20 = sld [smem:[#allocation2 + $0x1]]  ;;  %v23_v0 = vld [vmem:[%s130_s1] sm:$0x1] }
   0xd   :  { %s86_s23 = smov [#allocation5]  }
   0xe   :  { %s37_s24 = sshll.u32 %s86_s23, 4  ;;  %s38_s24 = int_to_ptr.vmem [resolvable:$true] %s37_s24 }
   0xf   :  { %s59_s25 = scalar_lea.vmem %s38_s24, 16  ;;  %s63_s0 = scalar_lea.vmem %s38_s24, 32 }
  0x10   :  { %p60_p3 = scmp.ne.s32.totalorder %s38_s24, %s59_s25  ;;  %p64_p4 = scmp.lt.s32.totalorder %s38_s24, %s38_s24 }
  0x11   :  { %p65_p5 = scmp.lt.s32.totalorder %s63_s0, %s59_s25 }
  0x12   :  { %v25_v1 = vstv %s24_s19  ;;  %v28_v2 = vstv %s46_s20 }
  0x13   :  { %v26_v3 = vmul.f32 %v25_v1, %v23_v0  ;;  %p66_p6 = por %p65_p5, %p64_p4 }
  0x15   :  { %v29_v4 = vadd.f32 %v28_v2, %v26_v3  ;;  %p67_p7 = pnand %p66_p6, %p60_p3 }
  0x17   :  { %30 = vst [vmem:[#allocation5] sm:$0x1] %v29_v4 }
  0x18   :  { %70 = shalt.err (!%p67_p7)
}
  0x19   :  { %s71_s1 = scalar_lea.hbm %s131_s2, 16 }
  0x1a   :  { %p72_p8 = scmp.ne.s32.totalorder %s131_s2, %s71_s1  ;;  %p75_p9 = scmp.lt.u32.totalorder %s71_s1, %s131_s2 }
  0x1c   :  { %p77_p10 = pnand %p75_p9, %p72_p8 }
  0x1e   :  { %80 = shalt.err (!%p77_p10)
}
  0x1f   :  { %40 = dma.vmem_to_hbm [thread:$0]  %s38_s24, 16, %s131_s2, [#allocation3]  }
  0x20   :  { %83 = dma.done.wait [#allocation3], 16  }
  0x21   :  { %84 = vsyncadd [#allocation3], 4294967280 }
  0x22   :  { %44 = vsyncpa [#allocation3], 1 }
  0x23   :  { %45 = vsyncpa [#allocation4], 1 }

</bundles_post_ra>
